<compile_context>
chip_gen: v7x
topology: tpu7x:2x2x1
jax: 0.10.0
libtpu: 0.0.40
codegen_flags: <defaults>
</compile_context>

<pallas_src>
import functools

import jax
import jax.numpy as jnp
from jax import lax
from jax.experimental import pallas as pl
from jax.experimental.pallas import tpu as pltpu


def _round_up(n, m):
    return ((n + m - 1) // m) * m


def _vmem_tile_cap(input_dim, hidden_sizes, x_itemsize, budget_bytes=12 << 20):
    """Largest TILE_B (multiple of 128) whose per-tile footprint (double-
    buffered x tile + f32 activations) stays under `budget_bytes`.

    12 MiB is safe even for v5e's 16 MiB default scoped VMEM; v6e/v7x have
    more headroom."""
    per_col = 2 * x_itemsize * input_dim + 4 * (2 * sum(hidden_sizes) + 4)
    cap = budget_bytes // max(per_col, 1)
    return max(128, (cap // 128) * 128)


def _batch_axis_semantics(num_tiles):
    """v7x: shard the batch grid axis across the 2 TensorCores; else parallel."""
    kind = ""
    try:
        kind = jax.devices()[0].device_kind.lower()
    except Exception:
        pass
    if num_tiles >= 2 and ("v7" in kind or "7x" in kind):
        return (pltpu.CORE_PARALLEL,)
    return ("parallel",)


def _mlp_kernel(n_hidden, use_sigmoid, precision, x_ref, *refs):
    """Fused MLP on one batch tile.

    x_ref : (TILE_B, input_dim)  -- natural layout, any float dtype
    refs  = (w0, b0, ..., w_{H-1}, b_{H-1}, w_last_col, b_last, out_ref)
      hidden w_i : (out_i, in_i)   -- native torch nn.Linear layout
      hidden b_i : (out_i, 1)      -- broadcasts along lanes (batch)
      w_last_col : (h_last, 1)     -- last Linear weight, transposed
      b_last     : (1, 1)
      out_ref    : (1, TILE_B)     -- lane-dense output slab
    """
    *param_refs, out_ref = refs

    x = x_ref[...].astype(jnp.float32)                      # (TILE_B, in_dim)

    if n_hidden == 0:
        h = jnp.transpose(x)                                 # (in_dim, TILE_B)
    else:
        # First layer: contract the natural-layout x tile directly.
        w0 = param_refs[0][...]                              # (out0, in_dim)
        b0 = param_refs[1][...]                              # (out0, 1)
        h = lax.dot_general(
            w0, x,
            dimension_numbers=(((1,), (1,)), ((), ())),
            preferred_element_type=jnp.float32,
            precision=precision,
        )                                                    # (out0, TILE_B)
        h = jnp.maximum(h + b0, 0.0)

        # Remaining hidden layers: feature-major, batch on lanes.
        for i in range(1, n_hidden):
            w = param_refs[2 * i][...]                       # (out_i, in_i)
            b = param_refs[2 * i + 1][...]                   # (out_i, 1)
            h = jnp.dot(w, h, preferred_element_type=jnp.float32,
                        precision=precision)
            h = jnp.maximum(h + b, 0.0)                      # (out_i, TILE_B)

    # Final Linear(h_last -> 1): VPU multiply + cross-sublane reduce (XLU)
    # instead of a 1-column MXU matmul; output stays lane-dense.
    w_last = param_refs[2 * n_hidden][...]                   # (h_last, 1)
    b_last = param_refs[2 * n_hidden + 1][...]               # (1, 1)
    y = jnp.sum(h * w_last, axis=0, keepdims=True) + b_last  # (1, TILE_B)
    if use_sigmoid:
        y = jax.nn.sigmoid(y)
    out_ref[...] = y.astype(out_ref.dtype)


def nnet_forward(x, weights, biases, *, sigmoid=False, tile_b=4096,
                 precision=jax.lax.Precision.HIGHEST):
    """Forward pass of Nnet.

    x          : (batch, input_dim) float32 (or bf16 on bandwidth-bound v5e)
    weights[i] : (out_i, in_i)  torch nn.Linear layout (last layer out = 1)
    biases[i]  : (out_i,)
    Returns (batch, 1) float32, matching the torch module's output shape.
    """
    batch, input_dim = x.shape
    n_layers = len(weights)
    n_hidden = n_layers - 1
    hidden_sizes = [int(w.shape[0]) for w in weights[:-1]]

    # Batch tile on lanes: multiple of 128, clamped to the batch and to a VMEM
    # budget that is safe on every generation (v5e 16 MiB scoped default,
    # v7x 64 MiB physical).
    cap = _vmem_tile_cap(input_dim, hidden_sizes, jnp.dtype(x.dtype).itemsize)
    tile_b = max(128, min(_round_up(tile_b, 128), _round_up(batch, 128), cap))
    num_tiles = pl.cdiv(batch, tile_b)
    grid = (num_tiles,)

    params = []
    param_specs = []
    for i in range(n_hidden):
        w = weights[i].astype(jnp.float32)                    # (out_i, in_i)
        b = biases[i].astype(jnp.float32).reshape(-1, 1)      # (out_i, 1)
        params += [w, b]
        param_specs += [
            pl.BlockSpec(w.shape, lambda g: (0, 0)),          # VMEM-resident
            pl.BlockSpec(b.shape, lambda g: (0, 0)),
        ]
    w_last = weights[-1].astype(jnp.float32).T                # (h_last, 1)
    b_last = biases[-1].astype(jnp.float32).reshape(1, 1)     # (1, 1)
    params += [w_last, b_last]
    param_specs += [
        pl.BlockSpec(w_last.shape, lambda g: (0, 0)),
        pl.BlockSpec(b_last.shape, lambda g: (0, 0)),
    ]

    flops = 2 * batch * sum(int(w.size) for w in weights)
    bytes_accessed = (int(x.size) * jnp.dtype(x.dtype).itemsize
                      + sum(int(p.size) * 4 for p in params)
                      + batch * 4)
    cost = pl.CostEstimate(
        flops=flops,
        transcendentals=batch if sigmoid else 0,
        bytes_accessed=bytes_accessed,
    )

    kernel = functools.partial(_mlp_kernel, n_hidden, sigmoid, precision)

    out = pl.pallas_call(
        kernel,
        out_shape=jax.ShapeDtypeStruct((1, batch), jnp.float32),
        grid=grid,
        in_specs=[pl.BlockSpec((tile_b, input_dim), lambda g: (g, 0))] + param_specs,
        out_specs=pl.BlockSpec((1, tile_b), lambda g: (0, g)),
        compiler_params=pltpu.CompilerParams(
            dimension_semantics=_batch_axis_semantics(num_tiles),
        ),
        cost_estimate=cost,
    )(x, *params)

    return out[0][:, None]                                    # (batch, 1)


def init_params(key, input_dim, hidden_layer_sizes):
    """torch.nn.Linear default init (U[-1/sqrt(fan_in), 1/sqrt(fan_in)]).

    Weights returned in torch layout (out_features, in_features), biases (out,).
    """
    sizes = [input_dim] + list(hidden_layer_sizes) + [1]
    weights, biases = [], []
    for in_f, out_f in zip(sizes[:-1], sizes[1:]):
        key, kw, kb = jax.random.split(key, 3)
        bound = 1.0 / float(in_f) ** 0.5
        weights.append(jax.random.uniform(kw, (out_f, in_f), jnp.float32, -bound, bound))
        biases.append(jax.random.uniform(kb, (out_f,), jnp.float32, -bound, bound))
    return weights, biases


def reference_forward(x, weights, biases, *, sigmoid=False):
    """Pure-JAX reference (torch-layout params)."""
    h = x
    n = len(weights)
    for i, (w, b) in enumerate(zip(weights, biases)):
        h = h @ w.T + b
        if i < n - 1:
            h = jnp.maximum(h, 0.0)
    if sigmoid:
        h = jax.nn.sigmoid(h)
    return h  # (batch, 1)


# TODO(synk): the LBFGS/Adam training loop, loss closure and DataLoader in the
# original module are host-side optimizer logic with no Pallas equivalent; only
# the forward pass is implemented here.

if __name__ == "__main__":
    key = jax.random.PRNGKey(0)

    input_dim = 16
    hidden_layer_sizes = [32, 32]

    # Case 1: small batch, sigmoid=False (Nnet default head). grid=(1,).
    batch = 8
    key, kx, kp = jax.random.split(key, 3)
    x = jax.random.normal(kx, (batch, input_dim), jnp.float32)
    weights, biases = init_params(kp, input_dim, hidden_layer_sizes)

    y = jax.block_until_ready(nnet_forward(x, weights, biases, sigmoid=False))
    y_ref = reference_forward(x, weights, biases, sigmoid=False)
    assert y.shape == (batch, 1)
    assert jnp.allclose(y, y_ref, atol=5e-3, rtol=1e-3), (y, y_ref)

    # Case 2: multi-tile grid with a partial last tile (640 = 2*256 + 128),
    # natural-layout x (no pad), sigmoid head.
    batch2 = 640
    key, kx2, kp2 = jax.random.split(key, 3)
    x2 = jax.random.normal(kx2, (batch2, input_dim), jnp.float32)
    w2, b2 = init_params(kp2, input_dim, hidden_layer_sizes)

    y2 = jax.block_until_ready(nnet_forward(x2, w2, b2, sigmoid=True, tile_b=256))
    y2_ref = reference_forward(x2, w2, b2, sigmoid=True)
    assert y2.shape == (batch2, 1)
    assert jnp.allclose(y2, y2_ref, atol=5e-3, rtol=1e-3), (y2, y2_ref)

    print("KERNEL_OK")
</pallas_src>

<mosaic_0001>
module attributes {stable_mosaic.version = 11 : i64} {
  func.func @_mlp_kernel(%arg0: i32, %arg1: memref<128x16xf32, #tpu.memory_space<vmem>>, %arg2: memref<32x16xf32, #tpu.memory_space<vmem>>, %arg3: memref<32x1xf32, #tpu.memory_space<vmem>>, %arg4: memref<32x32xf32, #tpu.memory_space<vmem>>, %arg5: memref<32x1xf32, #tpu.memory_space<vmem>>, %arg6: memref<32x1xf32, #tpu.memory_space<vmem>>, %arg7: memref<1x1xf32, #tpu.memory_space<vmem>>, %arg8: memref<1x128xf32, #tpu.memory_space<vmem>>) attributes {dimension_semantics = [#tpu.dimension_semantics<parallel>], iteration_bounds = array<i64: 1>, scalar_prefetch = 0 : i64, scratch_operands = 0 : i64, tpu.core_type = #tpu.core_type<tc>, window_params = [{transform_indices = @transform_0, window_bounds = array<i64: 128, 16>}, {pipeline_mode = #tpu.pipeline_mode<synchronous>, transform_indices = @transform_1, window_bounds = array<i64: 32, 16>}, {pipeline_mode = #tpu.pipeline_mode<synchronous>, transform_indices = @transform_2, window_bounds = array<i64: 32, 1>}, {pipeline_mode = #tpu.pipeline_mode<synchronous>, transform_indices = @transform_3, window_bounds = array<i64: 32, 32>}, {pipeline_mode = #tpu.pipeline_mode<synchronous>, transform_indices = @transform_4, window_bounds = array<i64: 32, 1>}, {pipeline_mode = #tpu.pipeline_mode<synchronous>, transform_indices = @transform_5, window_bounds = array<i64: 32, 1>}, {pipeline_mode = #tpu.pipeline_mode<synchronous>, transform_indices = @transform_6, window_bounds = array<i64: 1, 1>}, {transform_indices = @transform_7, window_bounds = array<i64: 1, 128>}]} {
    %c0 = arith.constant 0 : index
    %c0_0 = arith.constant 0 : index
    %0 = vector.load %arg1[%c0, %c0_0] : memref<128x16xf32, #tpu.memory_space<vmem>>, vector<128x16xf32>
    %c0_1 = arith.constant 0 : index
    %c0_2 = arith.constant 0 : index
    %1 = vector.load %arg2[%c0_1, %c0_2] : memref<32x16xf32, #tpu.memory_space<vmem>>, vector<32x16xf32>
    %c0_3 = arith.constant 0 : index
    %c0_4 = arith.constant 0 : index
    %2 = vector.load %arg3[%c0_3, %c0_4] : memref<32x1xf32, #tpu.memory_space<vmem>>, vector<32x1xf32>
    %cst = arith.constant dense<0.000000e+00> : vector<32x128xf32>
    %3 = tpu.matmul %1, %0, %cst {dimension_numbers = #tpu.dot_dimension_numbers<[1], [1], [0], [0], [0, 0, 1, 0], [], []>, precision = #tpu.contract_precision<fp32>} : vector<32x16xf32>, vector<128x16xf32>, vector<32x128xf32> -> vector<32x128xf32>
    %4 = vector.broadcast %2 : vector<32x1xf32> to vector<32x128xf32>
    %5 = arith.addf %3, %4 : vector<32x128xf32>
    %cst_5 = arith.constant 0.000000e+00 : f32
    %6 = vector.broadcast %cst_5 : f32 to vector<32x128xf32>
    %7 = arith.maximumf %5, %6 : vector<32x128xf32>
    %c0_6 = arith.constant 0 : index
    %c0_7 = arith.constant 0 : index
    %8 = vector.load %arg4[%c0_6, %c0_7] : memref<32x32xf32, #tpu.memory_space<vmem>>, vector<32x32xf32>
    %c0_8 = arith.constant 0 : index
    %c0_9 = arith.constant 0 : index
    %9 = vector.load %arg5[%c0_8, %c0_9] : memref<32x1xf32, #tpu.memory_space<vmem>>, vector<32x1xf32>
    %cst_10 = arith.constant dense<0.000000e+00> : vector<32x128xf32>
    %10 = tpu.matmul %8, %7, %cst_10 {dimension_numbers = #tpu.dot_dimension_numbers<[1], [0], [0], [1], [0, 0, 1, 1], [], []>, precision = #tpu.contract_precision<fp32>} : vector<32x32xf32>, vector<32x128xf32>, vector<32x128xf32> -> vector<32x128xf32>
    %11 = vector.broadcast %9 : vector<32x1xf32> to vector<32x128xf32>
    %12 = arith.addf %10, %11 : vector<32x128xf32>
    %cst_11 = arith.constant 0.000000e+00 : f32
    %13 = vector.broadcast %cst_11 : f32 to vector<32x128xf32>
    %14 = arith.maximumf %12, %13 : vector<32x128xf32>
    %c0_12 = arith.constant 0 : index
    %c0_13 = arith.constant 0 : index
    %15 = vector.load %arg6[%c0_12, %c0_13] : memref<32x1xf32, #tpu.memory_space<vmem>>, vector<32x1xf32>
    %c0_14 = arith.constant 0 : index
    %c0_15 = arith.constant 0 : index
    %16 = vector.load %arg7[%c0_14, %c0_15] : memref<1x1xf32, #tpu.memory_space<vmem>>, vector<1x1xf32>
    %17 = vector.broadcast %15 : vector<32x1xf32> to vector<32x128xf32>
    %18 = arith.mulf %14, %17 : vector<32x128xf32>
    %cst_16 = arith.constant dense<0.000000e+00> : vector<128xf32>
    %19 = vector.multi_reduction <add>, %18, %cst_16 [0] : vector<32x128xf32> to vector<128xf32>
    %20 = vector.shape_cast %19 : vector<128xf32> to vector<1x128xf32>
    %21 = vector.broadcast %16 : vector<1x1xf32> to vector<1x128xf32>
    %22 = arith.addf %20, %21 : vector<1x128xf32>
    %c0_17 = arith.constant 0 : index
    %c0_18 = arith.constant 0 : index
    %23 = vector.load %arg8[%c0_17, %c0_18] : memref<1x128xf32, #tpu.memory_space<vmem>>, vector<1x128xf32>
    tpu.vector_store %arg8[%c0_17, %c0_18], %22 {strides = array<i32>} : memref<1x128xf32, #tpu.memory_space<vmem>>, vector<1x128xf32>,
    return
  }
  func.func @transform_0(%arg0: i32) -> (i32, i32) {
    %c0_i32 = arith.constant 0 : i32
    %c0_i32_0 = arith.constant 0 : i32
    return %arg0, %c0_i32 : i32, i32
  }
  func.func @transform_1(%arg0: i32) -> (i32, i32) {
    %c0_i32 = arith.constant 0 : i32
    %c0_i32_0 = arith.constant 0 : i32
    %c0_i32_1 = arith.constant 0 : i32
    return %c0_i32, %c0_i32_0 : i32, i32
  }
  func.func @transform_2(%arg0: i32) -> (i32, i32) {
    %c0_i32 = arith.constant 0 : i32
    %c0_i32_0 = arith.constant 0 : i32
    %c0_i32_1 = arith.constant 0 : i32
    return %c0_i32, %c0_i32_0 : i32, i32
  }
  func.func @transform_3(%arg0: i32) -> (i32, i32) {
    %c0_i32 = arith.constant 0 : i32
    %c0_i32_0 = arith.constant 0 : i32
    %c0_i32_1 = arith.constant 0 : i32
    return %c0_i32, %c0_i32_0 : i32, i32
  }
  func.func @transform_4(%arg0: i32) -> (i32, i32) {
    %c0_i32 = arith.constant 0 : i32
    %c0_i32_0 = arith.constant 0 : i32
    %c0_i32_1 = arith.constant 0 : i32
    return %c0_i32, %c0_i32_0 : i32, i32
  }
  func.func @transform_5(%arg0: i32) -> (i32, i32) {
    %c0_i32 = arith.constant 0 : i32
    %c0_i32_0 = arith.constant 0 : i32
    %c0_i32_1 = arith.constant 0 : i32
    return %c0_i32, %c0_i32_0 : i32, i32
  }
  func.func @transform_6(%arg0: i32) -> (i32, i32) {
    %c0_i32 = arith.constant 0 : i32
    %c0_i32_0 = arith.constant 0 : i32
    %c0_i32_1 = arith.constant 0 : i32
    return %c0_i32, %c0_i32_0 : i32, i32
  }
  func.func @transform_7(%arg0: i32) -> (i32, i32) {
    %c0_i32 = arith.constant 0 : i32
    %c0_i32_0 = arith.constant 0 : i32
    return %c0_i32, %arg0 : i32, i32
  }
}

</mosaic_0001>

<bundles_post_ra>
// kernel: tpu_custom_call.1
= control target key start
LH: loop header
LB: loop body
LE: loop exit
PB: predicated region body
PF: predicated region fallthrough
CT: control target
= control target key end

     0   :  { %s2895_s0 = inlined_call_operand.vmem [shape: f32[8,16], index: 0, kind: input, shape index: {}]   ;;  %s2896_s1 = inlined_call_operand.vmem [shape: f32[32,16], index: 1, kind: input, shape index: {}]   ;;  %s2897_s2 = inlined_call_operand.vmem [shape: f32[32,1], index: 2, kind: input, shape index: {}]   ;;  %s2898_s3 = inlined_call_operand.vmem [shape: f32[32,32], index: 3, kind: input, shape index: {}]   ;;  %s2899_s4 = inlined_call_operand.vmem [shape: f32[32,1], index: 4, kind: input, shape index: {}]   ;;  %s2900_s5 = inlined_call_operand.vmem [shape: f32[32,1], index: 5, kind: input, shape index: {}]   ;;  %s2901_s6 = inlined_call_operand.<no memory space> [shape: f32[1,1], index: 6, kind: input, shape index: {}]   ;;  %s2902_s7 = inlined_call_operand.hbm [shape: f32[1,8], index: 7, kind: output, shape index: {}]  }
   0x1   :  { %v12_v0 = vstv %s2901_s6 }
   0x2   :  { %13 = vst [vmem:[#allocation2] sm:$0x1] %v12_v0 }
   0x3   :  { %v29_v1 = vld [vmem:[%s2895_s0] sm:$0xff]  ;;  %v30_v2 = vld [vmem:[%s2895_s0 + $0x8] sm:$0xff]  ;;  %vm73_vm0 = vcmask 130048   ;;  %v31_v3 = vld [vmem:[%s2895_s0 + $0x10] sm:$0xff] }
   0x4   :  { %v2481_v4 = vsel %vm73_vm0, %v29_v1, 0  ;;  %v2484_v5 = vsel %vm73_vm0, %v30_v2, 0  ;;  %v32_v6 = vld [vmem:[%s2895_s0 + $0x18] sm:$0xff]  ;;  %v2490_v7 = vsel %vm73_vm0, %v31_v3, 0  ;;  %v33_v12 = vld [vmem:[%s2895_s0 + $0x20] sm:$0xff]  ;;  %v34_v13 = vld [vmem:[%s2895_s0 + $0x28] sm:$0xff] }
   0x5   :  { %v135_v8 = vand.u32 4294901760, %v2481_v4  ;;  %v138_v9 = vand.u32 4294901760, %v2484_v5  ;;  %v2495_v10 = vsel %vm73_vm0, %v32_v6, 0  ;;  %v141_v11 = vand.u32 4294901760, %v2490_v7  ;;  %v45_v19 = vld [vmem:[%s2896_s1] sm:$0xff] }
   0x6   :  { %v144_v14 = vand.u32 4294901760, %v2495_v10  ;;  %v99_v17 = vsel %vm73_vm0, %v33_v12, 0  ;;  %v102_v18 = vsel %vm73_vm0, %v34_v13, 0 }
   0x7   :  { %v2505_v15 = vpack.c.bf16 %v138_v9, %v135_v8 }
   0x8   :  { %v2507_v16 = vpack.c.bf16 %v144_v14, %v141_v11 }
   0x9   :  { %2111 = vmatprep.subr.bf16.mxu1 %v2505_v15  ;;  %2207 = vmatprep.subr.bf16.mxu0 %v2505_v15 }
   0xa   :  { %2113 = vmatpush3.bf16.xpose.msra.mxu1 %v2505_v15  ;;  %2209 = vmatpush3.bf16.xpose.msra.mxu0 %v2505_v15 }
   0xb   :  { %14 = vsyncpa [#allocation4], 0  ;;  %2115 = vmatprep.subr.bf16.mxu1 %v2507_v16  ;;  %2211 = vmatprep.subr.bf16.mxu0 %v2507_v16  ;;  %v147_v20 = vand.u32 4294901760, %v99_v17  ;;  %v150_v21 = vand.u32 4294901760, %v102_v18  ;;  %v35_v22 = vld [vmem:[%s2895_s0 + $0x30] sm:$0xff]  ;;  %v36_v23 = vld [vmem:[%s2895_s0 + $0x38] sm:$0xff]  ;;  %v2571_v49 = vsub.f32 %v2481_v4, %v135_v8  ;;  %v2574_v50 = vsub.f32 %v2484_v5, %v138_v9 }
   0xc   :  { %v75_v24 = vsel %vm73_vm0, %v45_v19, 0  ;;  %v105_v27 = vsel %vm73_vm0, %v35_v22, 0  ;;  %v108_v28 = vsel %vm73_vm0, %v36_v23, 0  ;;  %v37_v34 = vld [vmem:[%s2895_s0 + $0x40] sm:$0xff]  ;;  %v38_v35 = vld [vmem:[%s2895_s0 + $0x48] sm:$0xff]  ;;  %v39_v42 = vld [vmem:[%s2895_s0 + $0x50] sm:$0xff]  ;;  %v2580_v52 = vsub.f32 %v2490_v7, %v141_v11 }
   0xd   :  { %v2527_v25 = vand.u32 4294901760, %v75_v24  ;;  %v2529_v26 = vpack.c.bf16 %v150_v21, %v147_v20  ;;  %v153_v31 = vand.u32 4294901760, %v105_v27  ;;  %v156_v32 = vand.u32 4294901760, %v108_v28  ;;  %v40_v43 = vld [vmem:[%s2895_s0 + $0x58] sm:$0xff]  ;;  %v41_v51 = vld [vmem:[%s2895_s0 + $0x60] sm:$0xff]  ;;  %v42_v56 = vld [vmem:[%s2895_s0 + $0x68] sm:$0xff] }
   0xe   :  { %v111_v38 = vsel %vm73_vm0, %v37_v34, 0  ;;  %v114_v39 = vsel %vm73_vm0, %v38_v35, 0  ;;  %v117_v45 = vsel %vm73_vm0, %v39_v42, 0  ;;  %v120_v46 = vsel %vm73_vm0, %v40_v43, 0  ;;  %v44_v11 = vld [vmem:[%s2895_s0 + $0x78] sm:$0xff]  ;;  %v46_v13 = vld [vmem:[%s2896_s1 + $0x8] sm:$0xff] }
   0xf   :  { %v2534_v29 = vsub.f32 %v75_v24, %v2527_v25  ;;  %v2548_v37 = vpack.c.bf16 %v156_v32, %v153_v31  ;;  %v159_v40 = vand.u32 4294901760, %v111_v38  ;;  %v162_v41 = vand.u32 4294901760, %v114_v39 }
  0x10   :  { %v165_v47 = vand.u32 4294901760, %v117_v45  ;;  %v168_v48 = vand.u32 4294901760, %v120_v46  ;;  %v2583_v53 = vsub.f32 %v2495_v10, %v144_v14  ;;  %v2585_v54 = vsub.f32 %v99_v17, %v147_v20  ;;  %v43_v10 = vld [vmem:[%s2895_s0 + $0x70] sm:$0xff] }
  0x11   :  { %v217_v30 = vand.u32 4294901760, %v2534_v29  ;;  %v2562_v44 = vpack.c.bf16 %v162_v41, %v159_v40  ;;  %v2587_v55 = vsub.f32 %v102_v18, %v150_v21  ;;  %v2592_v57 = vsub.f32 %v105_v27, %v153_v31  ;;  %v47_v21 = vld [vmem:[%s2896_s1 + $0x10] sm:$0xff] }
  0x12   :  { %2117 = vmatpush3.bf16.xpose.msra.mxu1 %v2507_v16  ;;  %2213 = vmatpush3.bf16.xpose.msra.mxu0 %v2507_v16  ;;  %v2594_v58 = vsub.f32 %v108_v28, %v156_v32  ;;  %v2598_v59 = vpack.c.bf16 %v2574_v50, %v2571_v49  ;;  %v2600_v60 = vsub.f32 %v111_v38, %v159_v40  ;;  %v123_v1 = vsel %vm73_vm0, %v41_v51, 0 }
  0x13   :  { %2119 = vmatprep.subr.bf16.mxu1 %v2529_v26  ;;  %2215 = vmatprep.subr.bf16.mxu0 %v2529_v26  ;;  %v218_v33 = vsub.f32 %v2534_v29, %v217_v30  ;;  %v2602_v61 = vsub.f32 %v114_v39, %v162_v41  ;;  %v2606_v62 = vpack.c.bf16 %v2583_v53, %v2580_v52  ;;  %v126_v3 = vsel %vm73_vm0, %v42_v56, 0 }
  0x14   :  { %1944 = vmatprep.mubr.f32.mxu0 %v217_v30  ;;  %v2610_v63 = vpack.c.bf16 %v2587_v55, %v2585_v54  ;;  %v2612_v0 = vpack.c.bf16 %v168_v48, %v165_v47  ;;  %v2617_v2 = vpack.c.bf16 %v2594_v58, %v2592_v57  ;;  %v2620_v4 = vsub.f32 %v117_v45, %v165_v47  ;;  %v48_v30 = vld [vmem:[%s2896_s1 + $0x18] sm:$0xff] }
  0x15   :  { %v219_v36 = vand.u32 4294901760, %v218_v33  ;;  %v2622_v5 = vsub.f32 %v120_v46, %v168_v48  ;;  %v2626_v6 = vpack.c.bf16 %v2602_v61, %v2600_v60  ;;  %v171_v8 = vand.u32 4294901760, %v123_v1 }
  0x16   :  { %v174_v9 = vand.u32 4294901760, %v126_v3  ;;  %v129_v14 = vsel %vm73_vm0, %v43_v10, 0  ;;  %v132_v17 = vsel %vm73_vm0, %v44_v11, 0  ;;  %v78_v20 = vsel %vm73_vm0, %v46_v13, 0 }
  0x17   :  { %1830 = vmatprep.mubr.f32.mxu1 %v219_v36  ;;  %v2632_v7 = vpack.c.bf16 %v2622_v5, %v2620_v4  ;;  %v2649_v18 = vsub.f32 %v123_v1, %v171_v8  ;;  %v177_v23 = vand.u32 4294901760, %v129_v14  ;;  %v180_v24 = vand.u32 4294901760, %v132_v17 }
  0x18   :  { %v2642_v12 = vpack.c.bf16 %v174_v9, %v171_v8  ;;  %v2651_v19 = vsub.f32 %v126_v3, %v174_v9  ;;  %v258_v27 = vand.u32 4294901760, %v2571_v49  ;;  %v265_v28 = vand.u32 4294901760, %v2574_v50 }
  0x19   :  { %v2670_v31 = vand.u32 4294901760, %v78_v20  ;;  %v81_v32 = vsel %vm73_vm0, %v47_v21, 0  ;;  %v84_v33 = vsel %vm73_vm0, %v48_v30, 0  ;;  %v2674_v34 = vpack.c.bf16 %v180_v24, %v177_v23 }
  0x1a   :  { %2121 = vmatpush3.bf16.xpose.msra.mxu1 %v2529_v26  ;;  %2217 = vmatpush3.bf16.xpose.msra.mxu0 %v2529_v26  ;;  %v2661_v22 = vpack.c.bf16 %v2651_v19, %v2649_v18  ;;  %v259_v35 = vsub.f32 %v2571_v49, %v258_v27  ;;  %v266_v36 = vsub.f32 %v2574_v50, %v265_v28  ;;  %v2682_v40 = vand.u32 4294901760, %v81_v32 }
  0x1b   :  { %2123 = vmatprep.subr.bf16.mxu1 %v2548_v37  ;;  %2219 = vmatprep.subr.bf16.mxu0 %v2548_v37  ;;  %v2678_v38 = vsub.f32 %v129_v14, %v177_v23  ;;  %v2680_v39 = vsub.f32 %v132_v17, %v180_v24  ;;  %v2685_v41 = vsub.f32 %v78_v20, %v2670_v31  ;;  %v2687_v42 = vand.u32 4294901760, %v84_v33 }
  0x1c   :  { %v260_v45 = vand.u32 4294901760, %v259_v35  ;;  %v267_v46 = vand.u32 4294901760, %v266_v36  ;;  %v272_v47 = vand.u32 4294901760, %v2580_v52  ;;  %v279_v48 = vand.u32 4294901760, %v2583_v53 }
  0x1d   :  { %v2693_v43 = vpack.c.bf16 %v2680_v39, %v2678_v38  ;;  %v2700_v49 = vsub.f32 %v81_v32, %v2682_v40  ;;  %v227_v50 = vand.u32 4294901760, %v2685_v41  ;;  %v2704_v51 = vsub.f32 %v84_v33, %v2687_v42 }
  0x1e   :  { %v2142_v56 = vpack.c.bf16 %v267_v46, %v260_v45  ;;  %v2238_v1 = vpack.c.bf16 %v265_v28, %v258_v27  ;;  %v273_v3 = vsub.f32 %v2580_v52, %v272_v47  ;;  %v280_v8 = vsub.f32 %v2583_v53, %v279_v48 }
  0x1f   :  { %v237_v9 = vand.u32 4294901760, %v2700_v49  ;;  %v228_v10 = vsub.f32 %v2685_v41, %v227_v50  ;;  %v247_v11 = vand.u32 4294901760, %v2704_v51  ;;  %v286_v17 = vand.u32 4294901760, %v2585_v54 }
  0x20   :  { %v274_v13 = vand.u32 4294901760, %v273_v3  ;;  %v281_v14 = vand.u32 4294901760, %v280_v8  ;;  %v293_v52 = vand.u32 4294901760, %v2587_v55  ;;  %v2242_v24 = vpack.c.bf16 %v279_v48, %v272_v47  ;;  %v52_v3 = vld [vmem:[%s2897_s2 + $0x18] sm:$0xff] }
  0x21   :  { %v238_v53 = vsub.f32 %v2700_v49, %v237_v9  ;;  %v229_v20 = vand.u32 4294901760, %v228_v10  ;;  %v248_v21 = vsub.f32 %v2704_v51, %v247_v11  ;;  %v287_v27 = vsub.f32 %v2585_v54, %v286_v17  ;;  %v49_v54 = vld [vmem:[%s2897_s2] sm:$0xff] }
  0x22   :  { %2125 = vmatpush3.bf16.xpose.msra.mxu1 %v2548_v37  ;;  %2221 = vmatpush3.bf16.xpose.msra.mxu0 %v2548_v37  ;;  %v2146_v23 = vpack.c.bf16 %v281_v14, %v274_v13  ;;  %v294_v28 = vsub.f32 %v2587_v55, %v293_v52  ;;  %v300_v36 = vand.u32 4294901760, %v2592_v57  ;;  %v307_v45 = vand.u32 4294901760, %v2594_v58  ;;  %v51_v55 = vld [vmem:[%s2897_s2 + $0x10] sm:$0xff]  ;;  %v912_v10 = vld [vmem:[%s2899_s4] sm:$0xff] }
  0x23   :  { %2127 = vmatprep.subr.bf16.mxu1 %v2562_v44  ;;  %2223 = vmatprep.subr.bf16.mxu0 %v2562_v44  ;;  %v239_v30 = vand.u32 4294901760, %v238_v53  ;;  %v249_v32 = vand.u32 4294901760, %v248_v21  ;;  %v288_v33 = vand.u32 4294901760, %v287_v27  ;;  %v2246_v46 = vpack.c.bf16 %v293_v52, %v286_v17  ;;  %v914_v53 = vld [vmem:[%s2899_s4 + $0x10] sm:$0xff]  ;;  %v1568_v27 = vld [vmem:[%s2900_s5 + $0x8] sm:$0xff] }
  0x24   :  { %v295_v35 = vand.u32 4294901760, %v294_v28  ;;  %v301_v48 = vsub.f32 %v2592_v57, %v300_v36  ;;  %v2250_v14 = vpack.c.bf16 %v307_v45, %v300_v36  ;;  %v1570_v36 = vld [vmem:[%s2900_s5 + $0x18] sm:$0xff]  ;;  %vm936_vm1 = vcmask 261120  }
  0x26   :  { %v2150_v47 = vpack.c.bf16 %v295_v35, %v288_v33  ;;  %v302_v57 = vand.u32 4294901760, %v301_v48  ;;  %v1569_v35 = vld [vmem:[%s2900_s5 + $0x10] sm:$0xff] }
  0x2a   :  { %2129 = vmatpush3.bf16.xpose.msra.mxu1 %v2562_v44  ;;  %2225 = vmatpush3.bf16.xpose.msra.mxu0 %v2562_v44 }
  0x2b   :  { %2131 = vmatprep.subr.bf16.mxu1 %v2612_v0  ;;  %2227 = vmatprep.subr.bf16.mxu0 %v2612_v0 }
  0x32   :  { %2133 = vmatpush3.bf16.xpose.msra.mxu1 %v2612_v0  ;;  %2229 = vmatpush3.bf16.xpose.msra.mxu0 %v2612_v0 }
  0x33   :  { %2135 = vmatprep.subr.bf16.mxu1 %v2642_v12  ;;  %2231 = vmatprep.subr.bf16.mxu0 %v2642_v12 }
  0x3a   :  { %2137 = vmatpush3.bf16.xpose.msra.mxu1 %v2642_v12  ;;  %2233 = vmatpush3.bf16.xpose.msra.mxu0 %v2642_v12 }
  0x3b   :  { %2139 = vmatprep.subr.bf16.mxu1 %v2674_v34  ;;  %2235 = vmatprep.subr.bf16.mxu0 %v2674_v34 }
  0x42   :  { %2141 = vmatpush3.bf16.xpose.msra.mxu1 %v2674_v34  ;;  %2237 = vmatpush3.bf16.xpose.msra.mxu0 %v2674_v34 }
  0x43   :  { %2143 = vmatprep.subr.bf16.mxu1 %v2142_v56  ;;  %2239 = vmatprep.subr.bf16.mxu0 %v2238_v1 }
  0x49   :  { %1831 = vmatmul.mubr.f32.vlgmr.msra.gmra.mrb[0].mxu1 %v229_v20  ;;  %1945 = vmatmul.mubr.f32.vlgmr.msra.gmra.mrb[0].mxu0 %v227_v50  ;;  %v308_v50 = vsub.f32 %v2594_v58, %v307_v45  ;;  %v314_v58 = vand.u32 4294901760, %v2600_v60  ;;  %v915_v20 = vld [vmem:[%s2899_s4 + $0x18] sm:$0xff] }
  0x4a   :  { %2145 = vmatpush3.bf16.xpose.msra.mxu1 %v2142_v56  ;;  %2241 = vmatpush3.bf16.xpose.msra.mxu0 %v2238_v1  ;;  %v2426_v56 = vmov 0   ;;  %v50_v1 = vld [vmem:[%s2897_s2 + $0x8] sm:$0xff] }
  0x4b   :  { %2147 = vmatprep.subr.bf16.mxu1 %v2146_v23  ;;  %2243 = vmatprep.subr.bf16.mxu0 %v2242_v24  ;;  %v309_v8 = vand.u32 4294901760, %v308_v50  ;;  %v315_v17 = vsub.f32 %v2600_v60, %v314_v58  ;;  %v328_v60 = vand.u32 4294901760, %v2620_v4 }
  0x4c   :  { %1833 = vmatprep.mubr.f32.mxu1 %v239_v30  ;;  %1947 = vmatprep.mubr.f32.mxu0 %v237_v9  ;;  %v321_v9 = vand.u32 4294901760, %v2602_v61 }
  0x4d   :  { %1834 = vmatmul.mubr.f32.gmra.mrb[2].mxu1 %v249_v32  ;;  %1948 = vmatmul.mubr.f32.gmra.mrb[2].mxu0 %v247_v11  ;;  %v913_v11 = vld [vmem:[%s2899_s4 + $0x8] sm:$0xff]  ;;  %v2154_v13 = vpack.c.bf16 %v309_v8, %v302_v57  ;;  %v316_v21 = vand.u32 4294901760, %v315_v17  ;;  %v329_v32 = vsub.f32 %v2620_v4, %v328_v60  ;;  %v342_v4 = vand.u32 4294901760, %v2649_v18 }
  0x4e   :  { %1868 = vmatprep.mubr.f32.mxu1 %v2527_v25  ;;  %1982 = vmatprep.mubr.f32.mxu0 %v2527_v25  ;;  %v322_v52 = vsub.f32 %v2602_v61, %v321_v9  ;;  %v335_v61 = vand.u32 4294901760, %v2622_v5  ;;  %v2254_v30 = vpack.c.bf16 %v321_v9, %v314_v58  ;;  %v363_v57 = vand.u32 4294901760, %v2680_v39 }
  0x4f   :  { %2400 = vset.pattern.permute.xlu0 %v2426_v56  ;;  %2401 = vset.pattern.permute.xlu1 %v2426_v56  ;;  %v330_v45 = vand.u32 4294901760, %v329_v32  ;;  %v343_v48 = vsub.f32 %v2649_v18, %v342_v4 }
  0x50   :  { %55 = vperm.xlu0 %2400, %v49_v54   ;;  %65 = vperm.xlu1 %2401, %v51_v55   ;;  %v336_v33 = vsub.f32 %v2622_v5, %v335_v61  ;;  %v349_v5 = vand.u32 4294901760, %v2651_v19  ;;  %v1571_v55 = vld [vmem:[#allocation2] sm:$0x1] }
  0x51   :  { %v344_v56 = vand.u32 4294901760, %v343_v48 }
  0x52   :  { %2149 = vmatpush3.bf16.xpose.msra.mxu1 %v2146_v23  ;;  %2245 = vmatpush3.bf16.xpose.msra.mxu0 %v2242_v24  ;;  %v323_v23 = vand.u32 4294901760, %v322_v52  ;;  %v1567_v24 = vld [vmem:[%s2900_s5] sm:$0xff]  ;;  %v337_v54 = vand.u32 4294901760, %v336_v33  ;;  %v350_v50 = vsub.f32 %v2651_v19, %v349_v5  ;;  %v2262_v58 = vpack.c.bf16 %v349_v5, %v342_v4 }
  0x53   :  { %2151 = vmatprep.subr.bf16.mxu1 %v2150_v47  ;;  %2247 = vmatprep.subr.bf16.mxu0 %v2246_v46 }
  0x54   :  { %60 = vperm.xlu0 %2400, %v50_v1   ;;  %70 = vperm.xlu1 %2401, %v52_v3   ;;  %v2158_v28 = vpack.c.bf16 %v323_v23, %v316_v21  ;;  %v351_v1 = vand.u32 4294901760, %v350_v50  ;;  %v356_v3 = vand.u32 4294901760, %v2678_v38 }
  0x56   :  { %v2166_v8 = vpack.c.bf16 %v351_v1, %v344_v56  ;;  %v357_v9 = vsub.f32 %v2678_v38, %v356_v3 }
  0x58   :  { %918 = vperm.xlu0 %2400, %v912_v10   ;;  %923 = vperm.xlu1 %2401, %v913_v11   ;;  %v364_v10 = vsub.f32 %v2680_v39, %v363_v57  ;;  %v358_v18 = vand.u32 4294901760, %v357_v9 }
  0x5a   :  { %2153 = vmatpush3.bf16.xpose.msra.mxu1 %v2150_v47  ;;  %2249 = vmatpush3.bf16.xpose.msra.mxu0 %v2246_v46  ;;  %v2162_v46 = vpack.c.bf16 %v337_v54, %v330_v45  ;;  %v2258_v47 = vpack.c.bf16 %v335_v61, %v328_v60  ;;  %v365_v19 = vand.u32 4294901760, %v364_v10 }
  0x5b   :  { %2155 = vmatprep.subr.bf16.mxu1 %v2154_v13  ;;  %2251 = vmatprep.subr.bf16.mxu0 %v2250_v14 }
  0x5c   :  { %928 = vperm.xlu0 %2400, %v914_v53   ;;  %933 = vperm.xlu1 %2401, %v915_v20   ;;  %v2170_v11 = vpack.c.bf16 %v365_v19, %v358_v18 }
  0x60   :  { %1574 = vperm.xlu0 %2400, %v1567_v24   ;;  %1579 = vperm.xlu1 %2401, %v1568_v27  }
  0x62   :  { %2157 = vmatpush3.bf16.xpose.msra.mxu1 %v2154_v13  ;;  %2253 = vmatpush3.bf16.xpose.msra.mxu0 %v2250_v14  ;;  %v2266_v13 = vpack.c.bf16 %v363_v57, %v356_v3 }
  0x63   :  { %2159 = vmatprep.subr.bf16.mxu1 %v2158_v28  ;;  %2255 = vmatprep.subr.bf16.mxu0 %v2254_v30 }
  0x64   :  { %1584 = vperm.xlu0 %2400, %v1569_v35   ;;  %1589 = vperm.xlu1 %2401, %v1570_v36  }
  0x68   :  { %1607 = vperm.xlu0 %2400, %v1571_v55  }
  0x6a   :  { %2161 = vmatpush3.bf16.xpose.msra.mxu1 %v2158_v28  ;;  %2257 = vmatpush3.bf16.xpose.msra.mxu0 %v2254_v30 }
  0x6b   :  { %2163 = vmatprep.subr.bf16.mxu1 %v2162_v46  ;;  %2259 = vmatprep.subr.bf16.mxu0 %v2258_v47 }
  0x72   :  { %2165 = vmatpush3.bf16.xpose.msra.mxu1 %v2162_v46  ;;  %2261 = vmatpush3.bf16.xpose.msra.mxu0 %v2258_v47 }
  0x73   :  { %2167 = vmatprep.subr.bf16.mxu1 %v2166_v8  ;;  %2263 = vmatprep.subr.bf16.mxu0 %v2262_v58 }
  0x7a   :  { %2169 = vmatpush3.bf16.xpose.msra.mxu1 %v2166_v8  ;;  %2265 = vmatpush3.bf16.xpose.msra.mxu0 %v2262_v58 }
  0x7b   :  { %2171 = vmatprep.subr.bf16.mxu1 %v2170_v11  ;;  %2267 = vmatprep.subr.bf16.mxu0 %v2266_v13 }
  0x82   :  { %2173 = vmatpush3.bf16.xpose.msra.mxu1 %v2170_v11  ;;  %2269 = vmatpush3.bf16.xpose.msra.mxu0 %v2266_v13 }
  0x83   :  { %2175 = vmatprep.subr.bf16.mxu1 %v2598_v59  ;;  %2271 = vmatprep.subr.bf16.mxu0 %v2505_v15 }
  0x89   :  { %1869 = vmatmul.mubr.f32.vlgmr.msra.gmra.mrb[0].mxu1 %v2670_v31  ;;  %1983 = vmatmul.mubr.f32.vlgmr.msra.gmra.mrb[0].mxu0 %v2670_v31 }
  0x8a   :  { %2177 = vmatpush3.bf16.xpose.msra.mxu1 %v2598_v59  ;;  %2273 = vmatpush3.bf16.xpose.msra.mxu0 %v2505_v15  ;;  %v908_v15 = vld [vmem:[%s2898_s3] sm:$0xff] }
  0x8b   :  { %2179 = vmatprep.subr.bf16.mxu1 %v2606_v62  ;;  %2275 = vmatprep.subr.bf16.mxu0 %v2507_v16 }
  0x8c   :  { %1871 = vmatprep.mubr.f32.mxu1 %v2682_v40  ;;  %1985 = vmatprep.mubr.f32.mxu0 %v2682_v40 }
  0x8d   :  { %1872 = vmatmul.mubr.f32.gmra.mrb[2].mxu1 %v2687_v42  ;;  %1986 = vmatmul.mubr.f32.gmra.mrb[2].mxu0 %v2687_v42 }
  0x8e   :  { %1906 = vmatprep.mubr.f32.mxu1 %v2534_v29  ;;  %2020 = vmatprep.mubr.f32.mxu0 %v2527_v25 }
  0x92   :  { %2181 = vmatpush3.bf16.xpose.msra.mxu1 %v2606_v62  ;;  %2277 = vmatpush3.bf16.xpose.msra.mxu0 %v2507_v16  ;;  %v938_v16 = vsel %vm936_vm1, %v908_v15, 0  ;;  %v909_v62 = vld [vmem:[%s2898_s3 + $0x8] sm:$0xff] }
  0x93   :  { %2183 = vmatprep.subr.bf16.mxu1 %v2610_v63  ;;  %2279 = vmatprep.subr.bf16.mxu0 %v2529_v26  ;;  %v2827_v25 = vand.u32 4294901760, %v938_v16 }
  0x9a   :  { %2185 = vmatpush3.bf16.xpose.msra.mxu1 %v2610_v63  ;;  %2281 = vmatpush3.bf16.xpose.msra.mxu0 %v2529_v26  ;;  %v2830_v26 = vsub.f32 %v938_v16, %v2827_v25  ;;  %v910_v63 = vld [vmem:[%s2898_s3 + $0x10] sm:$0xff] }
  0x9b   :  { %2187 = vmatprep.subr.bf16.mxu1 %v2617_v2  ;;  %2283 = vmatprep.subr.bf16.mxu0 %v2548_v37 }
  0x9c   :  { %v1020_v29 = vand.u32 4294901760, %v2830_v26 }
  0xa2   :  { %2189 = vmatpush3.bf16.xpose.msra.mxu1 %v2617_v2  ;;  %2285 = vmatpush3.bf16.xpose.msra.mxu0 %v2548_v37  ;;  %v1021_v37 = vsub.f32 %v2830_v26, %v1020_v29 }
  0xa3   :  { %2191 = vmatprep.subr.bf16.mxu1 %v2626_v6  ;;  %2287 = vmatprep.subr.bf16.mxu0 %v2562_v44 }
  0xaa   :  { %2193 = vmatpush3.bf16.xpose.msra.mxu1 %v2626_v6  ;;  %2289 = vmatpush3.bf16.xpose.msra.mxu0 %v2562_v44  ;;  %v1022_v44 = vand.u32 4294901760, %v1021_v37  ;;  %v944_v6 = vsel %vm936_vm1, %v910_v63, 0 }
  0xab   :  { %2195 = vmatprep.subr.bf16.mxu1 %v2632_v7  ;;  %2291 = vmatprep.subr.bf16.mxu0 %v2612_v0 }
  0xb2   :  { %2197 = vmatpush3.bf16.xpose.msra.mxu1 %v2632_v7  ;;  %2293 = vmatpush3.bf16.xpose.msra.mxu0 %v2612_v0  ;;  %v941_v0 = vsel %vm936_vm1, %v909_v62, 0  ;;  %v911_v7 = vld [vmem:[%s2898_s3 + $0x18] sm:$0xff]  ;;  %s2427_s3 = smov [#allocation3]  }
  0xb3   :  { %2199 = vmatprep.subr.bf16.mxu1 %v2661_v22  ;;  %2295 = vmatprep.subr.bf16.mxu0 %v2642_v12  ;;  %s1622_s19 = sshll.u32 %s2427_s3, 4  ;;  %s1623_s19 = int_to_ptr.vmem [resolvable:$true] %s1622_s19 }
  0xb4   :  { %s2402_s20 = scalar_lea.vmem %s1623_s19, 16  ;;  %s2406_s21 = scalar_lea.vmem %s1623_s19, 32 }
  0xb5   :  { %p2403_p0 = scmp.ne.s32.totalorder %s1623_s19, %s2402_s20  ;;  %p2407_p1 = scmp.lt.s32.totalorder %s1623_s19, %s1623_s19 }
  0xb6   :  { %p2408_p2 = scmp.lt.s32.totalorder %s2406_s21, %s2402_s20 }
  0xb8   :  { %p2409_p3 = por %p2408_p2, %p2407_p1 }
  0xba   :  { %2201 = vmatpush3.bf16.xpose.msra.mxu1 %v2661_v22  ;;  %2297 = vmatpush3.bf16.xpose.msra.mxu0 %v2642_v12  ;;  %v2845_v22 = vand.u32 4294901760, %v941_v0  ;;  %p2410_p4 = pnand %p2409_p3, %p2403_p0 }
  0xbb   :  { %2203 = vmatprep.subr.bf16.mxu1 %v2693_v43  ;;  %2299 = vmatprep.subr.bf16.mxu0 %v2674_v34 }
  0xbc   :  { %v2851_v14 = vsub.f32 %v941_v0, %v2845_v22 }
  0xbe   :  { %v1030_v33 = vand.u32 4294901760, %v2851_v14 }
  0xc0   :  { %v1031_v56 = vsub.f32 %v2851_v14, %v1030_v33 }
  0xc2   :  { %2205 = vmatpush3.bf16.xpose.msra.mxu1 %v2693_v43  ;;  %2301 = vmatpush3.bf16.xpose.msra.mxu0 %v2674_v34  ;;  %v1032_v15 = vand.u32 4294901760, %v1031_v56 }
  0xc9   :  { %1907 = vmatmul.mubr.f32.vlgmr.msra.gmra.mrb[0].mxu1 %v2685_v41  ;;  %2021 = vmatmul.mubr.f32.vlgmr.msra.gmra.mrb[0].mxu0 %v2670_v31  ;;  %v2847_v41 = vand.u32 4294901760, %v944_v6 }
  0xca   :  { %1909 = vmatprep.mubr.f32.mxu1 %v2700_v49  ;;  %2023 = vmatprep.mubr.f32.mxu0 %v2682_v40 }
  0xcb   :  { %v2856_v24 = vsub.f32 %v944_v6, %v2847_v41 }
  0xcd   :  { %1910 = vmatmul.mubr.f32.gmra.mrb[2].mxu1 %v2704_v51  ;;  %2024 = vmatmul.mubr.f32.gmra.mrb[2].mxu0 %v2687_v42  ;;  %v947_v42 = vsel %vm936_vm1, %v911_v7, 0  ;;  %v1040_v5 = vand.u32 4294901760, %v2856_v24 }
  0xce   :  { %2076 = vmatprep.mubr.f32.mxu1 %v1020_v29  ;;  %2034 = vmatprep.mubr.f32.mxu0 %v1022_v44  ;;  %v2853_v20 = vand.u32 4294901760, %v947_v42 }
  0xcf   :  { %v56_v59 = vpop.permute.xlu0 %55  ;;  %v66_v2 = vpop.permute.xlu1 %65  ;;  %v1041_v10 = vsub.f32 %v2856_v24, %v1040_v5 }
  0xd0   :  { %v2860_v45 = vsub.f32 %v947_v42, %v2853_v20 }
  0xd1   :  { %v1042_v6 = vand.u32 4294901760, %v1041_v10 }
  0xd2   :  { %v1050_v57 = vand.u32 4294901760, %v2860_v45 }
  0xd3   :  { %v61_v12 = vpop.permute.xlu0 %60  ;;  %v71_v49 = vpop.permute.xlu1 %70 }
 0x19c   :  { %v1908_v31 = vpop.f32.mrb[0].mxu1  ;;  %v2022_v34 = vpop.f32.mrb[0].mxu0 }
 0x19d   :  { %v2350_v38 = vadd.f32 %v1908_v31, %v61_v12  ;;  %v524_v39 = vpop.f32.mrb[1].mxu1  ;;  %v882_v40 = vpop.f32.mrb[1].mxu0 }
 0x19e   :  { %v2352_v43 = vadd.f32 %v524_v39, %v56_v59  ;;  %v1051_v59 = vsub.f32 %v2860_v45, %v1050_v57  ;;  %v919_v39 = vpop.permute.xlu0 %918 }
 0x19f   :  { %v2351_v51 = vadd.f32 %v2350_v38, %v2022_v34 }
 0x1a0   :  { %v2353_v17 = vadd.f32 %v2352_v43, %v882_v40  ;;  %v1911_v52 = vpop.f32.mrb[2].mxu1  ;;  %v2025_v53 = vpop.f32.mrb[2].mxu0  ;;  %v1052_v31 = vand.u32 4294901760, %v1051_v59 }
 0x1a1   :  { %v905_v21 = vmax.f32 %v2351_v51, 0.0  ;;  %v2354_v23 = vadd.f32 %v1911_v52, %v71_v49  ;;  %v538_v60 = vpop.f32.mrb[3].mxu1  ;;  %v894_v61 = vpop.f32.mrb[3].mxu0 }
 0x1a2   :  { %v904_v27 = vmax.f32 %v2353_v17, 0.0  ;;  %v2356_v28 = vadd.f32 %v538_v60, %v66_v2  ;;  %v924_v40 = vpop.permute.xlu1 %923  ;;  %v929_v42 = vpop.permute.xlu0 %928 }
 0x1a3   :  { %v953_v30 = vand.u32 4294901760, %v905_v21  ;;  %v2355_v32 = vadd.f32 %v2354_v23, %v2025_v53 }
 0x1a4   :  { %v950_v35 = vand.u32 4294901760, %v904_v27  ;;  %v2357_v36 = vadd.f32 %v2356_v28, %v894_v61 }
 0x1a5   :  { %v1067_v54 = vsub.f32 %v905_v21, %v953_v30  ;;  %v907_v4 = vmax.f32 %v2355_v32, 0.0 }
 0x1a6   :  { %v2302_v55 = vpack.c.bf16 %v953_v30, %v950_v35  ;;  %v1060_v46 = vsub.f32 %v904_v27, %v950_v35  ;;  %v906_v47 = vmax.f32 %v2357_v36, 0.0  ;;  %v934_v43 = vpop.permute.xlu1 %933 }
 0x1a7   :  { %v959_v48 = vand.u32 4294901760, %v907_v4  ;;  %v1068_v50 = vand.u32 4294901760, %v1067_v54 }
 0x1a8   :  { %v956_v1 = vand.u32 4294901760, %v906_v47  ;;  %2303 = vmatprep.subr.bf16.mxu0 %v2302_v55  ;;  %2327 = vmatprep.subr.bf16.mxu1 %v2302_v55  ;;  %v1061_v3 = vand.u32 4294901760, %v1060_v46  ;;  %v2318_v8 = vpack.c.bf16 %v1067_v54, %v1060_v46 }
 0x1a9   :  { %v1081_v58 = vsub.f32 %v907_v4, %v959_v48  ;;  %2305 = vmatpush3.bf16.msra.mxu0 %v2302_v55  ;;  %2329 = vmatpush3.bf16.msra.mxu1 %v2302_v55  ;;  %v1069_v9 = vsub.f32 %v1067_v54, %v1068_v50 }
 0x1aa   :  { %v2306_v18 = vpack.c.bf16 %v959_v48, %v956_v1  ;;  %v1074_v19 = vsub.f32 %v906_v47, %v956_v1  ;;  %v2334_v11 = vpack.c.bf16 %v1068_v50, %v1061_v3  ;;  %v1062_v13 = vsub.f32 %v1060_v46, %v1061_v3 }
 0x1ab   :  { %v1070_v16 = vand.u32 4294901760, %v1069_v9  ;;  %v1082_v29 = vand.u32 4294901760, %v1081_v58  ;;  %v1610_v48 = vlaneseq }
 0x1ac   :  { %2307 = vmatprep.subr.bf16.mxu0 %v2306_v18  ;;  %2331 = vmatprep.subr.bf16.mxu1 %v2306_v18  ;;  %v1063_v37 = vand.u32 4294901760, %v1062_v13  ;;  %v1075_v44 = vand.u32 4294901760, %v1074_v19  ;;  %v2322_v62 = vpack.c.bf16 %v1081_v58, %v1074_v19 }
 0x1ad   :  { %2309 = vmatpush3.bf16.msra.mxu0 %v2306_v18  ;;  %2333 = vmatpush3.bf16.msra.mxu1 %v2306_v18  ;;  %v1083_v63 = vsub.f32 %v1081_v58, %v1082_v29  ;;  %v1611_v1 = vshrl.u32 %v1610_v48, 7 }
 0x1ae   :  { %2335 = vmatprep.subr.bf16.mxu1 %v2334_v11  ;;  %v2310_v0 = vpack.c.bf16 %v1070_v16, %v1063_v37  ;;  %v2338_v2 = vpack.c.bf16 %v1082_v29, %v1075_v44  ;;  %v1076_v7 = vsub.f32 %v1074_v19, %v1075_v44 }
 0x1af   :  { %v1084_v12 = vand.u32 4294901760, %v1083_v63 }
 0x1b0   :  { %2035 = vmatmul.mubr.f32.vlgmr.msra.gmra.mrb[4].mxu0 %v1032_v15  ;;  %2311 = vmatprep.subr.bf16.mxu0 %v2310_v0  ;;  %v1077_v34 = vand.u32 4294901760, %v1076_v7 }
 0x1b1   :  { %2077 = vmatmul.mubr.f32.vlgmr.msra.gmra.mrb[4].mxu1 %v1030_v33  ;;  %2313 = vmatpush3.bf16.msra.mxu0 %v2310_v0 }
 0x1b2   :  { %2337 = vmatpush3.bf16.msra.mxu1 %v2334_v11  ;;  %2037 = vmatprep.mubr.f32.mxu0 %v1042_v6  ;;  %v2314_v38 = vpack.c.bf16 %v1084_v12, %v1077_v34 }
 0x1b3   :  { %2339 = vmatprep.subr.bf16.mxu1 %v2338_v2  ;;  %2079 = vmatprep.mubr.f32.mxu1 %v1040_v5 }
 0x1b4   :  { %2038 = vmatmul.mubr.f32.gmra.mrb[6].mxu0 %v1052_v31  ;;  %2315 = vmatprep.subr.bf16.mxu0 %v2314_v38 }
 0x1b5   :  { %2080 = vmatmul.mubr.f32.gmra.mrb[6].mxu1 %v1050_v57  ;;  %2317 = vmatpush3.bf16.msra.mxu0 %v2314_v38 }
 0x1b6   :  { %2341 = vmatpush3.bf16.msra.mxu1 %v2338_v2  ;;  %2319 = vmatprep.subr.bf16.mxu0 %v2318_v8 }
 0x1b7   :  { %2343 = vmatprep.subr.bf16.mxu1 %v2302_v55  ;;  %2048 = vmatprep.mubr.f32.mxu0 %v2827_v25 }
 0x1b8   :  { %2090 = vmatprep.mubr.f32.mxu1 %v2827_v25  ;;  %2049 = vmatmul.mubr.f32.vlgmr.msra.gmra.mrb[4].mxu0 %v2845_v22 }
 0x1b9   :  { %2091 = vmatmul.mubr.f32.vlgmr.msra.gmra.mrb[4].mxu1 %v2845_v22  ;;  %2321 = vmatpush3.bf16.msra.mxu0 %v2318_v8  ;;  %v1612_v8 = vsub.s32 0, %v1611_v1 }
 0x1ba   :  { %2345 = vmatpush3.bf16.msra.mxu1 %v2302_v55  ;;  %2323 = vmatprep.subr.bf16.mxu0 %v2322_v62 }
 0x1bb   :  { %2347 = vmatprep.subr.bf16.mxu1 %v2306_v18  ;;  %2051 = vmatprep.mubr.f32.mxu0 %v2847_v41 }
 0x1bc   :  { %2093 = vmatprep.mubr.f32.mxu1 %v2847_v41  ;;  %2052 = vmatmul.mubr.f32.gmra.mrb[6].mxu0 %v2853_v20 }
 0x1bd   :  { %2094 = vmatmul.mubr.f32.gmra.mrb[6].mxu1 %v2853_v20  ;;  %2325 = vmatpush3.bf16.msra.mxu0 %v2322_v62 }
 0x1be   :  { %2349 = vmatpush3.bf16.msra.mxu1 %v2306_v18  ;;  %2062 = vmatprep.mubr.f32.mxu0 %v2830_v26 }
 0x1bf   :  { %2104 = vmatprep.mubr.f32.mxu1 %v2827_v25 }
 0x1c0   :  { %2063 = vmatmul.mubr.f32.vlgmr.msra.gmra.mrb[4].mxu0 %v2851_v14 }
 0x1c1   :  { %2105 = vmatmul.mubr.f32.vlgmr.msra.gmra.mrb[4].mxu1 %v2845_v22  ;;  %2065 = vmatprep.mubr.f32.mxu0 %v2856_v24  ;;  %v1575_v22 = vpop.permute.xlu0 %1574  ;;  %v1580_v24 = vpop.permute.xlu1 %1579 }
 0x1c2   :  { %2107 = vmatprep.mubr.f32.mxu1 %v2847_v41 }
 0x1c4   :  { %2066 = vmatmul.mubr.f32.gmra.mrb[6].mxu0 %v2860_v45 }
 0x1c5   :  { %2108 = vmatmul.mubr.f32.gmra.mrb[6].mxu1 %v2853_v20  ;;  %v1585_v4 = vpop.permute.xlu0 %1584  ;;  %v1590_v55 = vpop.permute.xlu1 %1589 }
 0x1c9   :  { %v1608_v9 = vpop.permute.xlu0 %1607 }
 0x1ca   :  { %v1613_v18 = vrot.slane %v1608_v9, %v1612_v8 }
 0x293   :  { %v2064_v49 = vpop.f32.mrb[4].mxu0 }
 0x294   :  { %v2358_v26 = vadd.f32 %v2064_v49, %v924_v40  ;;  %v2106_v51 = vpop.f32.mrb[4].mxu1  ;;  %v1243_v25 = vpop.f32.mrb[5].mxu0 }
 0x295   :  { %v2360_v17 = vadd.f32 %v1243_v25, %v919_v39  ;;  %v1541_v14 = vpop.f32.mrb[5].mxu1 }
 0x296   :  { %v2359_v52 = vadd.f32 %v2358_v26, %v2106_v51 }
 0x297   :  { %v2361_v53 = vadd.f32 %v2360_v17, %v1541_v14  ;;  %v2067_v21 = vpop.f32.mrb[6].mxu0 }
 0x298   :  { %v1564_v23 = vmax.f32 %v2359_v52, 0.0  ;;  %v2362_v41 = vadd.f32 %v2067_v21, %v934_v43  ;;  %v2109_v60 = vpop.f32.mrb[6].mxu1  ;;  %v1257_v61 = vpop.f32.mrb[7].mxu0 }
 0x299   :  { %v1563_v20 = vmax.f32 %v2361_v53, 0.0  ;;  %v2364_v27 = vadd.f32 %v1257_v61, %v929_v42  ;;  %v1553_v28 = vpop.f32.mrb[7].mxu1 }
 0x29a   :  { %v1593_v30 = vmul.f32 %v1580_v24, %v1564_v23  ;;  %v2363_v32 = vadd.f32 %v2362_v41, %v2109_v60 }
 0x29b   :  { %v1592_v33 = vmul.f32 %v1575_v22, %v1563_v20  ;;  %v2365_v35 = vadd.f32 %v2364_v27, %v1553_v28 }
 0x29c   :  { %v1566_v45 = vmax.f32 %v2363_v32, 0.0 }
 0x29d   :  { %v1596_v36 = vadd.f32 %v1593_v30, %v1592_v33  ;;  %v1565_v54 = vmax.f32 %v2365_v35, 0.0 }
 0x29e   :  { %v1595_v46 = vmul.f32 %v1590_v55, %v1566_v45 }
 0x29f   :  { %v1594_v5 = vmul.f32 %v1585_v4, %v1565_v54 }
 0x2a1   :  { %v1597_v47 = vadd.f32 %v1596_v36, %v1594_v5 }
 0x2a3   :  { %v1598_v50 = vadd.f32 %v1597_v47, %v1595_v46 }
 0x2a5   :  { %v1599_v56 = vrot.slane %v1598_v50, 4 }
 0x2a7   :  { %v1600_v3 = vadd.f32 %v1599_v56, %v1598_v50 }
 0x2a9   :  { %v1601_v57 = vrot.slane %v1600_v3, 2 }
 0x2ab   :  { %v1602_v58 = vadd.f32 %v1601_v57, %v1600_v3 }
 0x2ad   :  { %v1603_v10 = vrot.slane %v1602_v58, 1 }
 0x2af   :  { %v1604_v19 = vadd.f32 %v1603_v10, %v1602_v58 }
 0x2b1   :  { %v1614_v11 = vadd.f32 %v1613_v18, %v1604_v19 }
 0x2b3   :  { %1615 = vst [vmem:[#allocation3] sm:$0x1] %v1614_v11 }
 0x2b4   :  { %2413 = shalt.err (!%p2410_p4)
}
 0x2b5   :  { %s2414_s24 = scalar_lea.hbm %s2902_s7, 16 }
 0x2b6   :  { %p2415_p5 = scmp.ne.s32.totalorder %s2902_s7, %s2414_s24  ;;  %p2418_p6 = scmp.lt.u32.totalorder %s2414_s24, %s2902_s7 }
 0x2b8   :  { %p2420_p7 = pnand %p2418_p6, %p2415_p5 }
 0x2ba   :  { %2423 = shalt.err (!%p2420_p7)
}
 0x2bb   :  { %1625 = dma.vmem_to_hbm [thread:$0]  %s1623_s19, 16, %s2902_s7, [#allocation4]  }
 0x2bc   :  { %2424 = dma.done.wait [#allocation4], 16  }
 0x2bd   :  { %2425 = vsyncadd [#allocation4], 4294967280 }
 0x2be   :  { %1629 = vsyncpa [#allocation4], 1 }

</bundles_post_ra>
